<compile_context>
chip_gen: v7x
topology: tpu7x:2x2x1
jax: 0.10.0
libtpu: 0.0.40
codegen_flags: <defaults>
</compile_context>

<pallas_src>
import jax
import jax.numpy as jnp
from jax.experimental import pallas as pl
from jax.experimental.pallas import tpu as pltpu

POOL = 2          # max_pool2d kernel/stride
LANE = 128        # TPU lane width: Cout padded to this (lane-dense stores)
SUBLANE = 8
MAX_TM = 2048     # pooled-position rows per grid step (upper bound)


def _round_up(x, m):
    return (x + m - 1) // m * m


def conv_pool_relu_kernel(p_ref, w_ref, b_ref, o_ref):
    # p_ref: (4, TM, K) bf16 patches grouped by 2x2 pool-window offset
    # w_ref: (K, 128) bf16   b_ref: (1, 128) f32   o_ref: (TM, 128)
    w = w_ref[...]
    # Pool-max folded into the accumulation: 4 dots -> running jnp.maximum,
    # keeping only a (TM, 128) f32 value live (no big reshape / max tree).
    m = jnp.dot(p_ref[0], w, preferred_element_type=jnp.float32)
    for t in range(1, p_ref.shape[0]):
        m = jnp.maximum(m, jnp.dot(p_ref[t], w, preferred_element_type=jnp.float32))
    # bias hoisted out of the pool-max (max_t(x) + b == max_t(x + b)), then relu
    o_ref[...] = jnp.maximum(m + b_ref[...], 0.0).astype(o_ref.dtype)


def _im2col_pool_groups(x_nhwc, ksize, pool, c_real):
    """Glue: VALID-conv patches grouped by pool-window offset via strided slices
    (no 6-D transpose).  The channel slice [:c_real] is folded into each strided
    slice so XLA fuses it (handles the lane-padded inter-stage activation with
    no extra HBM pass).  Returns (pool*pool, N*OHp*OWp, KH*KW*c_real); K order
    is (kh, kw, cin)."""
    N, H, W, _ = x_nhwc.shape
    OH, OW = H - ksize + 1, W - ksize + 1
    assert OH % pool == 0 and OW % pool == 0, (
        "conv output spatial dims must be divisible by the pool size")
    OHp, OWp = OH // pool, OW // pool
    K = ksize * ksize * c_real
    groups = []
    for ph in range(pool):
        for pw in range(pool):
            cols = []
            for i in range(ksize):
                for j in range(ksize):
                    h0, w0 = ph + i, pw + j
                    cols.append(x_nhwc[:, h0:h0 + pool * (OHp - 1) + 1:pool,
                                          w0:w0 + pool * (OWp - 1) + 1:pool, :c_real])
            groups.append(jnp.concatenate(cols, axis=-1).reshape(N * OHp * OWp, K))
    return jnp.stack(groups, axis=0), (N, OHp, OWp)


def conv_pool_relu_stage(x_nhwc, w_oihw, b, *, out_dtype):
    """Fused conv2d(valid, stride 1) -> max_pool2d(2) -> relu in one Pallas kernel.
    Returns NHWC output with the channel axis zero-padded to LANE (caller slices)."""
    Cout, Cin, KH, KW = w_oihw.shape
    # bf16 BEFORE the im2col gather: halves the bytes moved by the XLA glue.
    x_nhwc = x_nhwc.astype(jnp.bfloat16)
    P, (N, OHp, OWp) = _im2col_pool_groups(x_nhwc, KH, POOL, Cin)
    M, K = P.shape[1], P.shape[2]          # K = KH*KW*Cin, left UNPADDED in HBM
    Cp = _round_up(Cout, LANE)             # lane-dense output channels (keep 128)

    # >= 2 grid steps so v7x can shard the M axis across its two TensorCores;
    # cap the tile at MAX_TM and round so row padding stays minimal.
    n_steps = max(2, -(-M // MAX_TM))
    TM = _round_up(-(-M // n_steps), SUBLANE)
    Mp = TM * n_steps
    if Mp > M:
        P = jnp.pad(P, ((0, 0), (0, Mp - M), (0, 0)))

    # flatten weight to (KH*KW*Cin, Cout); K ordering (kh, kw, cin) matches patches
    Wf = jnp.transpose(w_oihw, (2, 3, 1, 0)).reshape(K, Cout)
    Wf = jnp.pad(Wf, ((0, 0), (0, Cp - Cout))).astype(jnp.bfloat16)
    Bf = jnp.pad(b.reshape(1, Cout), ((0, 0), (0, Cp - Cout))).astype(jnp.float32)

    n_pool = POOL * POOL
    flops = 2 * n_pool * Mp * K * Cp
    bytes_accessed = (n_pool * Mp * K * 2 + K * Cp * 2 + Cp * 4
                      + Mp * Cp * jnp.dtype(out_dtype).itemsize)

    out = pl.pallas_call(
        conv_pool_relu_kernel,
        out_shape=jax.ShapeDtypeStruct((Mp, Cp), out_dtype),
        grid_spec=pltpu.PrefetchScalarGridSpec(
            num_scalar_prefetch=0,
            grid=(n_steps,),
            in_specs=[
                # last dim == full array dim (25 / 250): legal, no zero-fill DMA'd
                pl.BlockSpec((n_pool, TM, K), lambda m: (0, m, 0)),
                pl.BlockSpec((K, Cp), lambda m: (0, 0)),
                pl.BlockSpec((1, Cp), lambda m: (0, 0)),
            ],
            out_specs=pl.BlockSpec((TM, Cp), lambda m: (m, 0)),
        ),
        compiler_params=pltpu.CompilerParams(
            dimension_semantics=("parallel",),
            vmem_limit_bytes=32 * 1024 * 1024,
        ),
        cost_estimate=pl.CostEstimate(flops=flops, transcendentals=0,
                                      bytes_accessed=bytes_accessed),
    )(P, Wf, Bf)
    # drop padded rows; row order is (n, ohp, owp) so this reshape needs no transpose
    return out[:M].reshape(N, OHp, OWp, Cp)


def submodel_forward(x_nchw, params):
    # x: (N, 1, 28, 28) NCHW (PyTorch convention) -> NHWC (channels on lanes).
    x = jnp.transpose(x_nchw, (0, 2, 3, 1))
    c2 = params["w2"].shape[0]
    # stage 1: conv1 -> maxpool2 -> relu (bf16 activation fed straight into stage 2;
    # its 128-lane channel padding is NOT sliced here -- the real-channel slice is
    # folded into stage 2's im2col gather, avoiding an extra HBM round trip).
    a1 = conv_pool_relu_stage(x, params["w1"], params["b1"], out_dtype=jnp.bfloat16)
    # TODO(synk): nn.Dropout2d is identity in eval mode; training-mode channel dropout not applied.
    a2 = conv_pool_relu_stage(a1, params["w2"], params["b2"], out_dtype=jnp.float32)
    a2 = a2[..., :c2]
    return jnp.transpose(a2, (0, 3, 1, 2))  # -> (N, 20, 4, 4) NCHW


def reference_forward(x_nchw, params):
    """Pure-JAX f32 reference (lax conv / reduce_window) for correctness checking."""
    dn = ("NCHW", "OIHW", "NCHW")
    y = jax.lax.conv_general_dilated(x_nchw, params["w1"], (1, 1), "VALID",
                                     dimension_numbers=dn) + params["b1"][None, :, None, None]
    y = jax.lax.reduce_window(y, -jnp.inf, jax.lax.max, (1, 1, 2, 2), (1, 1, 2, 2), "VALID")
    y = jnp.maximum(y, 0.0)
    y = jax.lax.conv_general_dilated(y, params["w2"], (1, 1), "VALID",
                                     dimension_numbers=dn) + params["b2"][None, :, None, None]
    y = jax.lax.reduce_window(y, -jnp.inf, jax.lax.max, (1, 1, 2, 2), (1, 1, 2, 2), "VALID")
    return jnp.maximum(y, 0.0)


if __name__ == "__main__":
    key = jax.random.PRNGKey(0)
    kx, k1, k2, k3, k4 = jax.random.split(key, 5)
    # MNIST-like small input: batch=2, 1 channel, 28x28 spatial.
    x = jax.random.normal(kx, (2, 1, 28, 28), jnp.float32)
    params = {
        "w1": 0.1 * jax.random.normal(k1, (10, 1, 5, 5), jnp.float32),   # conv1 weight
        "b1": 0.1 * jax.random.normal(k2, (10,), jnp.float32),           # conv1 bias
        "w2": 0.1 * jax.random.normal(k3, (20, 10, 5, 5), jnp.float32),  # conv2 weight
        "b2": 0.1 * jax.random.normal(k4, (20,), jnp.float32),           # conv2 bias
    }

    out = jax.jit(submodel_forward)(x, params)
    out = jax.block_until_ready(out)
    assert out.shape == (2, 20, 4, 4), out.shape

    ref = reference_forward(x, params)
    # bf16 patches/weights + bf16 inter-stage activation -> loosened (but still tight) tolerance.
    # This is a deliberate precision choice to halve HBM/VMEM traffic.
    assert jnp.allclose(out, ref, rtol=5e-2, atol=5e-2), float(jnp.max(jnp.abs(out - ref)))

    print("KERNEL_OK")
</pallas_src>

<mosaic_0001>
module attributes {stable_mosaic.version = 11 : i64} {
  func.func @conv_pool_relu_kernel(%arg0: i32, %arg1: memref<4x144x25xbf16, #tpu.memory_space<vmem>>, %arg2: memref<25x128xbf16, #tpu.memory_space<vmem>>, %arg3: memref<1x128xf32, #tpu.memory_space<vmem>>, %arg4: memref<144x128xbf16, #tpu.memory_space<vmem>>) attributes {dimension_semantics = [#tpu.dimension_semantics<parallel>], iteration_bounds = array<i64: 2>, scalar_prefetch = 0 : i64, scratch_operands = 0 : i64, tpu.core_type = #tpu.core_type<tc>, window_params = [{transform_indices = @transform_0, window_bounds = array<i64: 4, 144, 25>}, {pipeline_mode = #tpu.pipeline_mode<synchronous>, transform_indices = @transform_1, window_bounds = array<i64: 25, 128>}, {pipeline_mode = #tpu.pipeline_mode<synchronous>, transform_indices = @transform_2, window_bounds = array<i64: 1, 128>}, {transform_indices = @transform_3, window_bounds = array<i64: 144, 128>}]} {
    %c0 = arith.constant 0 : index
    %c0_0 = arith.constant 0 : index
    %0 = vector.load %arg2[%c0, %c0_0] : memref<25x128xbf16, #tpu.memory_space<vmem>>, vector<25x128xbf16>
    %c0_1 = arith.constant 0 : index
    %c0_2 = arith.constant 0 : index
    %c0_3 = arith.constant 0 : index
    %1 = vector.load %arg1[%c0_1, %c0_2, %c0_3] : memref<4x144x25xbf16, #tpu.memory_space<vmem>>, vector<1x144x25xbf16>
    %2 = vector.shape_cast %1 : vector<1x144x25xbf16> to vector<144x25xbf16>
    %cst = arith.constant dense<0.000000e+00> : vector<144x128xf32>
    %3 = tpu.matmul %2, %0, %cst {dimension_numbers = #tpu.dot_dimension_numbers<[1], [0], [0], [1], [0, 0, 1, 1], [], []>} : vector<144x25xbf16>, vector<25x128xbf16>, vector<144x128xf32> -> vector<144x128xf32>
    %c1 = arith.constant 1 : index
    %c0_4 = arith.constant 0 : index
    %c0_5 = arith.constant 0 : index
    %4 = vector.load %arg1[%c1, %c0_4, %c0_5] : memref<4x144x25xbf16, #tpu.memory_space<vmem>>, vector<1x144x25xbf16>
    %5 = vector.shape_cast %4 : vector<1x144x25xbf16> to vector<144x25xbf16>
    %cst_6 = arith.constant dense<0.000000e+00> : vector<144x128xf32>
    %6 = tpu.matmul %5, %0, %cst_6 {dimension_numbers = #tpu.dot_dimension_numbers<[1], [0], [0], [1], [0, 0, 1, 1], [], []>} : vector<144x25xbf16>, vector<25x128xbf16>, vector<144x128xf32> -> vector<144x128xf32>
    %7 = arith.maximumf %3, %6 : vector<144x128xf32>
    %c2 = arith.constant 2 : index
    %c0_7 = arith.constant 0 : index
    %c0_8 = arith.constant 0 : index
    %8 = vector.load %arg1[%c2, %c0_7, %c0_8] : memref<4x144x25xbf16, #tpu.memory_space<vmem>>, vector<1x144x25xbf16>
    %9 = vector.shape_cast %8 : vector<1x144x25xbf16> to vector<144x25xbf16>
    %cst_9 = arith.constant dense<0.000000e+00> : vector<144x128xf32>
    %10 = tpu.matmul %9, %0, %cst_9 {dimension_numbers = #tpu.dot_dimension_numbers<[1], [0], [0], [1], [0, 0, 1, 1], [], []>} : vector<144x25xbf16>, vector<25x128xbf16>, vector<144x128xf32> -> vector<144x128xf32>
    %11 = arith.maximumf %7, %10 : vector<144x128xf32>
    %c3 = arith.constant 3 : index
    %c0_10 = arith.constant 0 : index
    %c0_11 = arith.constant 0 : index
    %12 = vector.load %arg1[%c3, %c0_10, %c0_11] : memref<4x144x25xbf16, #tpu.memory_space<vmem>>, vector<1x144x25xbf16>
    %13 = vector.shape_cast %12 : vector<1x144x25xbf16> to vector<144x25xbf16>
    %cst_12 = arith.constant dense<0.000000e+00> : vector<144x128xf32>
    %14 = tpu.matmul %13, %0, %cst_12 {dimension_numbers = #tpu.dot_dimension_numbers<[1], [0], [0], [1], [0, 0, 1, 1], [], []>} : vector<144x25xbf16>, vector<25x128xbf16>, vector<144x128xf32> -> vector<144x128xf32>
    %15 = arith.maximumf %11, %14 : vector<144x128xf32>
    %c0_13 = arith.constant 0 : index
    %c0_14 = arith.constant 0 : index
    %16 = vector.load %arg3[%c0_13, %c0_14] : memref<1x128xf32, #tpu.memory_space<vmem>>, vector<1x128xf32>
    %17 = vector.broadcast %16 : vector<1x128xf32> to vector<144x128xf32>
    %18 = arith.addf %15, %17 : vector<144x128xf32>
    %cst_15 = arith.constant 0.000000e+00 : f32
    %19 = vector.broadcast %cst_15 : f32 to vector<144x128xf32>
    %20 = arith.maximumf %18, %19 : vector<144x128xf32>
    %21 = arith.truncf %20 : vector<144x128xf32> to vector<144x128xbf16>
    %c0_16 = arith.constant 0 : index
    %c0_17 = arith.constant 0 : index
    %22 = vector.load %arg4[%c0_16, %c0_17] : memref<144x128xbf16, #tpu.memory_space<vmem>>, vector<144x128xbf16>
    tpu.vector_store %arg4[%c0_16, %c0_17], %21 {strides = array<i32>} : memref<144x128xbf16, #tpu.memory_space<vmem>>, vector<144x128xbf16>,
    return
  }
  func.func @transform_0(%arg0: i32) -> (i32, i32, i32) {
    %c0_i32 = arith.constant 0 : i32
    %c0_i32_0 = arith.constant 0 : i32
    %c0_i32_1 = arith.constant 0 : i32
    return %c0_i32, %arg0, %c0_i32_0 : i32, i32, i32
  }
  func.func @transform_1(%arg0: i32) -> (i32, i32) {
    %c0_i32 = arith.constant 0 : i32
    %c0_i32_0 = arith.constant 0 : i32
    %c0_i32_1 = arith.constant 0 : i32
    return %c0_i32, %c0_i32_0 : i32, i32
  }
  func.func @transform_2(%arg0: i32) -> (i32, i32) {
    %c0_i32 = arith.constant 0 : i32
    %c0_i32_0 = arith.constant 0 : i32
    %c0_i32_1 = arith.constant 0 : i32
    return %c0_i32, %c0_i32_0 : i32, i32
  }
  func.func @transform_3(%arg0: i32) -> (i32, i32) {
    %c0_i32 = arith.constant 0 : i32
    %c0_i32_0 = arith.constant 0 : i32
    return %arg0, %c0_i32 : i32, i32
  }
}

module attributes {stable_mosaic.version = 11 : i64} {
  func.func @conv_pool_relu_kernel(%arg0: i32, %arg1: memref<4x16x250xbf16, #tpu.memory_space<vmem>>, %arg2: memref<250x128xbf16, #tpu.memory_space<vmem>>, %arg3: memref<1x128xf32, #tpu.memory_space<vmem>>, %arg4: memref<16x128xf32, #tpu.memory_space<vmem>>) attributes {dimension_semantics = [#tpu.dimension_semantics<parallel>], iteration_bounds = array<i64: 2>, scalar_prefetch = 0 : i64, scratch_operands = 0 : i64, tpu.core_type = #tpu.core_type<tc>, window_params = [{transform_indices = @transform_0, window_bounds = array<i64: 4, 16, 250>}, {pipeline_mode = #tpu.pipeline_mode<synchronous>, transform_indices = @transform_1, window_bounds = array<i64: 250, 128>}, {pipeline_mode = #tpu.pipeline_mode<synchronous>, transform_indices = @transform_2, window_bounds = array<i64: 1, 128>}, {transform_indices = @transform_3, window_bounds = array<i64: 16, 128>}]} {
    %c0 = arith.constant 0 : index
    %c0_0 = arith.constant 0 : index
    %0 = vector.load %arg2[%c0, %c0_0] : memref<250x128xbf16, #tpu.memory_space<vmem>>, vector<250x128xbf16>
    %c0_1 = arith.constant 0 : index
    %c0_2 = arith.constant 0 : index
    %c0_3 = arith.constant 0 : index
    %1 = vector.load %arg1[%c0_1, %c0_2, %c0_3] : memref<4x16x250xbf16, #tpu.memory_space<vmem>>, vector<1x16x250xbf16>
    %2 = vector.shape_cast %1 : vector<1x16x250xbf16> to vector<16x250xbf16>
    %cst = arith.constant dense<0.000000e+00> : vector<16x128xf32>
    %3 = tpu.matmul %2, %0, %cst {dimension_numbers = #tpu.dot_dimension_numbers<[1], [0], [0], [1], [0, 0, 1, 1], [], []>} : vector<16x250xbf16>, vector<250x128xbf16>, vector<16x128xf32> -> vector<16x128xf32>
    %c1 = arith.constant 1 : index
    %c0_4 = arith.constant 0 : index
    %c0_5 = arith.constant 0 : index
    %4 = vector.load %arg1[%c1, %c0_4, %c0_5] : memref<4x16x250xbf16, #tpu.memory_space<vmem>>, vector<1x16x250xbf16>
    %5 = vector.shape_cast %4 : vector<1x16x250xbf16> to vector<16x250xbf16>
    %cst_6 = arith.constant dense<0.000000e+00> : vector<16x128xf32>
    %6 = tpu.matmul %5, %0, %cst_6 {dimension_numbers = #tpu.dot_dimension_numbers<[1], [0], [0], [1], [0, 0, 1, 1], [], []>} : vector<16x250xbf16>, vector<250x128xbf16>, vector<16x128xf32> -> vector<16x128xf32>
    %7 = arith.maximumf %3, %6 : vector<16x128xf32>
    %c2 = arith.constant 2 : index
    %c0_7 = arith.constant 0 : index
    %c0_8 = arith.constant 0 : index
    %8 = vector.load %arg1[%c2, %c0_7, %c0_8] : memref<4x16x250xbf16, #tpu.memory_space<vmem>>, vector<1x16x250xbf16>
    %9 = vector.shape_cast %8 : vector<1x16x250xbf16> to vector<16x250xbf16>
    %cst_9 = arith.constant dense<0.000000e+00> : vector<16x128xf32>
    %10 = tpu.matmul %9, %0, %cst_9 {dimension_numbers = #tpu.dot_dimension_numbers<[1], [0], [0], [1], [0, 0, 1, 1], [], []>} : vector<16x250xbf16>, vector<250x128xbf16>, vector<16x128xf32> -> vector<16x128xf32>
    %11 = arith.maximumf %7, %10 : vector<16x128xf32>
    %c3 = arith.constant 3 : index
    %c0_10 = arith.constant 0 : index
    %c0_11 = arith.constant 0 : index
    %12 = vector.load %arg1[%c3, %c0_10, %c0_11] : memref<4x16x250xbf16, #tpu.memory_space<vmem>>, vector<1x16x250xbf16>
    %13 = vector.shape_cast %12 : vector<1x16x250xbf16> to vector<16x250xbf16>
    %cst_12 = arith.constant dense<0.000000e+00> : vector<16x128xf32>
    %14 = tpu.matmul %13, %0, %cst_12 {dimension_numbers = #tpu.dot_dimension_numbers<[1], [0], [0], [1], [0, 0, 1, 1], [], []>} : vector<16x250xbf16>, vector<250x128xbf16>, vector<16x128xf32> -> vector<16x128xf32>
    %15 = arith.maximumf %11, %14 : vector<16x128xf32>
    %c0_13 = arith.constant 0 : index
    %c0_14 = arith.constant 0 : index
    %16 = vector.load %arg3[%c0_13, %c0_14] : memref<1x128xf32, #tpu.memory_space<vmem>>, vector<1x128xf32>
    %17 = vector.broadcast %16 : vector<1x128xf32> to vector<16x128xf32>
    %18 = arith.addf %15, %17 : vector<16x128xf32>
    %cst_15 = arith.constant 0.000000e+00 : f32
    %19 = vector.broadcast %cst_15 : f32 to vector<16x128xf32>
    %20 = arith.maximumf %18, %19 : vector<16x128xf32>
    %c0_16 = arith.constant 0 : index
    %c0_17 = arith.constant 0 : index
    %21 = vector.load %arg4[%c0_16, %c0_17] : memref<16x128xf32, #tpu.memory_space<vmem>>, vector<16x128xf32>
    tpu.vector_store %arg4[%c0_16, %c0_17], %20 {strides = array<i32>} : memref<16x128xf32, #tpu.memory_space<vmem>>, vector<16x128xf32>,
    return
  }
  func.func @transform_0(%arg0: i32) -> (i32, i32, i32) {
    %c0_i32 = arith.constant 0 : i32
    %c0_i32_0 = arith.constant 0 : i32
    %c0_i32_1 = arith.constant 0 : i32
    return %c0_i32, %arg0, %c0_i32_0 : i32, i32, i32
  }
  func.func @transform_1(%arg0: i32) -> (i32, i32) {
    %c0_i32 = arith.constant 0 : i32
    %c0_i32_0 = arith.constant 0 : i32
    %c0_i32_1 = arith.constant 0 : i32
    return %c0_i32, %c0_i32_0 : i32, i32
  }
  func.func @transform_2(%arg0: i32) -> (i32, i32) {
    %c0_i32 = arith.constant 0 : i32
    %c0_i32_0 = arith.constant 0 : i32
    %c0_i32_1 = arith.constant 0 : i32
    return %c0_i32, %c0_i32_0 : i32, i32
  }
  func.func @transform_3(%arg0: i32) -> (i32, i32) {
    %c0_i32 = arith.constant 0 : i32
    %c0_i32_0 = arith.constant 0 : i32
    return %arg0, %c0_i32 : i32, i32
  }
}

</mosaic_0001>

<bundles_post_ra>
// kernel: submodel_forward.2
= control target key start
LH: loop header
LB: loop body
LE: loop exit
PB: predicated region body
PF: predicated region fallthrough
CT: control target
= control target key end

     0   :  { %s2101_s12 = smov 0   ;;  %s2103_s13 = smov 0   ;;  %s2585_s0 = inlined_call_operand.vmem [shape: bf16[4,288,25], index: 0, kind: input, shape index: {}]   ;;  %s2586_s1 = inlined_call_operand.vmem [shape: bf16[25,128], index: 1, kind: input, shape index: {}]   ;;  %s2587_s2 = inlined_call_operand.vmem [shape: f32[1,128], index: 2, kind: input, shape index: {}]   ;;  %s2588_s3 = inlined_call_operand.vmem [shape: bf16[288,128], index: 3, kind: output, shape index: {}]  }
   0x1   :  { %s2105_s14 = smov 0  }
   0x2 LB: > { %s1555_s15 = sadd.s32 4294967295, %s2076_s14   ;;  %s2118_s16 = sadd.s32 1, %s2076_s14   ;;  %s2076_s14 = sphi %s2105_s14, %s2594_s14   ;;  %s2072_s13 = sphi %s2103_s13, %s2593_s13   ;;  %s2068_s12 = sphi %s2101_s12, %s2592_s12  }
   0x3   : > { %s17_s17 = ssub.s32 %s2076_s14, %s2118_s16  ;;  %s20_s18 = sadd.s32 1, %s2072_s13 }
   0x4   : > { %p18_p0 = scmp.eq.s32.totalorder %s17_s17, 0  ;;  %p27_p1 = scmp.ne.s32.totalorder %s2072_s13, %s2068_s12 }
   0x5   : > { %p28_p2 = scmp.eq.s32.totalorder %s2076_s14, 0  ;;  %p1558_p4 = scmp.ge.s32.totalorder %s2076_s14, 2 }
   0x6   : > { %s2127_s19 = scalar_select %p18_p0, %s2072_s13, %s20_s18  }
   0x7   : > { %p29_p3 = por %p28_p2, %p27_p1  ;;  %127 = sbr.rel (%p1558_p4) target bundleno = 37 (0x25), region = 24 }
   0xe   : > { %130 = sbr.rel (!%p29_p3) target bundleno = 37 (0x25), region = 28  ;;  %s132_s20 = sand.u32 (%p29_p3), 1, %s2072_s13  }
   0xf   : > { %s1711_s21 = smul.u32 (%p29_p3), 72, %s2076_s14 }
  0x10   : > { %s1987_s22 = smul.u32 (%p29_p3), 288, %s132_s20 }
  0x11   : > { %s2135_s25 = scalar_lea.vmem (%p29_p3), %s2585_s0, %s1711_s21 }
  0x12   : > { %v153_v0 = vld [vmem:[%s2135_s25] sm:$0xff] (%p29_p3)   ;;  %v157_v1 = vld [vmem:[%s2135_s25 + $0x8] sm:$0xff] (%p29_p3)   ;;  %v161_v2 = vld [vmem:[%s2135_s25 + $0x10] sm:$0xff] (%p29_p3)   ;;  %s2140_s26 = scalar_lea.vmem (%p29_p3), [#allocation2], %s1987_s22 }
  0x13   : > { %154 = vst [vmem:[%s2140_s26] sm:$0xff] (%p29_p3), %v153_v0   ;;  %158 = vst [vmem:[%s2140_s26 + $0x8] sm:$0xff] (%p29_p3), %v157_v1   ;;  %v165_v3 = vld [vmem:[%s2135_s25 + $0x18] sm:$0xff] (%p29_p3)   ;;  %v169_v4 = vld [vmem:[%s2135_s25 + $0x20] sm:$0xff] (%p29_p3)  }
  0x14   : > { %162 = vst [vmem:[%s2140_s26 + $0x10] sm:$0xff] (%p29_p3), %v161_v2   ;;  %v173_v5 = vld [vmem:[%s2135_s25 + $0x28] sm:$0xff] (%p29_p3)   ;;  %166 = vst [vmem:[%s2140_s26 + $0x18] sm:$0xff] (%p29_p3), %v165_v3   ;;  %v177_v6 = vld [vmem:[%s2135_s25 + $0x30] sm:$0xff] (%p29_p3)  }
  0x15   : > { %170 = vst [vmem:[%s2140_s26 + $0x20] sm:$0xff] %v169_v4   ;;  %174 = vst [vmem:[%s2140_s26 + $0x28] sm:$0xff] %v173_v5   ;;  %v181_v7 = vld [vmem:[%s2135_s25 + $0x38] sm:$0xff]   ;;  %v185_v8 = vld [vmem:[%s2135_s25 + $0x40] sm:$0xff]  }
  0x16   : > { %178 = vst [vmem:[%s2140_s26 + $0x30] sm:$0xff] %v177_v6   ;;  %182 = vst [vmem:[%s2140_s26 + $0x38] sm:$0xff] %v181_v7   ;;  %v189_v9 = vld [vmem:[%s2135_s25 + $0x90] sm:$0xff]   ;;  %v193_v10 = vld [vmem:[%s2135_s25 + $0x98] sm:$0xff]  }
  0x17   : > { %186 = vst [vmem:[%s2140_s26 + $0x40] sm:$0xff] %v185_v8   ;;  %v197_v11 = vld [vmem:[%s2135_s25 + $0xa0] sm:$0xff]   ;;  %190 = vst [vmem:[%s2140_s26 + $0x48] sm:$0xff] %v189_v9   ;;  %v201_v12 = vld [vmem:[%s2135_s25 + $0xa8] sm:$0xff]  }
  0x18   : > { %194 = vst [vmem:[%s2140_s26 + $0x50] sm:$0xff] %v193_v10   ;;  %198 = vst [vmem:[%s2140_s26 + $0x58] sm:$0xff] %v197_v11   ;;  %v205_v13 = vld [vmem:[%s2135_s25 + $0xb0] sm:$0xff]   ;;  %v209_v14 = vld [vmem:[%s2135_s25 + $0xb8] sm:$0xff]  }
  0x19   : > { %202 = vst [vmem:[%s2140_s26 + $0x60] sm:$0xff] %v201_v12   ;;  %206 = vst [vmem:[%s2140_s26 + $0x68] sm:$0xff] %v205_v13   ;;  %v213_v15 = vld [vmem:[%s2135_s25 + $0xc0] sm:$0xff]   ;;  %v217_v16 = vld [vmem:[%s2135_s25 + $0xc8] sm:$0xff]  }
  0x1a   : > { %210 = vst [vmem:[%s2140_s26 + $0x70] sm:$0xff] %v209_v14   ;;  %v221_v17 = vld [vmem:[%s2135_s25 + $0xd0] sm:$0xff]   ;;  %214 = vst [vmem:[%s2140_s26 + $0x78] sm:$0xff] %v213_v15   ;;  %v225_v18 = vld [vmem:[%s2135_s25 + $0x120] sm:$0xff]  }
  0x1b   : > { %218 = vst [vmem:[%s2140_s26 + $0x80] sm:$0xff] %v217_v16   ;;  %222 = vst [vmem:[%s2140_s26 + $0x88] sm:$0xff] %v221_v17   ;;  %v229_v19 = vld [vmem:[%s2135_s25 + $0x128] sm:$0xff]   ;;  %v233_v20 = vld [vmem:[%s2135_s25 + $0x130] sm:$0xff]  }
  0x1c   : > { %226 = vst [vmem:[%s2140_s26 + $0x90] sm:$0xff] %v225_v18   ;;  %230 = vst [vmem:[%s2140_s26 + $0x98] sm:$0xff] %v229_v19   ;;  %v237_v21 = vld [vmem:[%s2135_s25 + $0x138] sm:$0xff]   ;;  %v241_v22 = vld [vmem:[%s2135_s25 + $0x140] sm:$0xff]  }
  0x1d   : > { %234 = vst [vmem:[%s2140_s26 + $0xa0] sm:$0xff] %v233_v20   ;;  %v245_v23 = vld [vmem:[%s2135_s25 + $0x148] sm:$0xff]   ;;  %238 = vst [vmem:[%s2140_s26 + $0xa8] sm:$0xff] %v237_v21   ;;  %v249_v24 = vld [vmem:[%s2135_s25 + $0x150] sm:$0xff]  }
  0x1e   : > { %242 = vst [vmem:[%s2140_s26 + $0xb0] sm:$0xff] %v241_v22   ;;  %246 = vst [vmem:[%s2140_s26 + $0xb8] sm:$0xff] %v245_v23   ;;  %v253_v25 = vld [vmem:[%s2135_s25 + $0x158] sm:$0xff]   ;;  %v257_v26 = vld [vmem:[%s2135_s25 + $0x160] sm:$0xff]  }
  0x1f   : > { %250 = vst [vmem:[%s2140_s26 + $0xc0] sm:$0xff] %v249_v24   ;;  %254 = vst [vmem:[%s2140_s26 + $0xc8] sm:$0xff] %v253_v25   ;;  %v261_v27 = vld [vmem:[%s2135_s25 + $0x1b0] sm:$0xff]   ;;  %v265_v28 = vld [vmem:[%s2135_s25 + $0x1b8] sm:$0xff]  }
  0x20   : > { %258 = vst [vmem:[%s2140_s26 + $0xd0] sm:$0xff] %v257_v26   ;;  %v269_v29 = vld [vmem:[%s2135_s25 + $0x1c0] sm:$0xff]   ;;  %262 = vst [vmem:[%s2140_s26 + $0xd8] sm:$0xff] %v261_v27   ;;  %v273_v30 = vld [vmem:[%s2135_s25 + $0x1c8] sm:$0xff]  }
  0x21   : > { %266 = vst [vmem:[%s2140_s26 + $0xe0] sm:$0xff] %v265_v28   ;;  %270 = vst [vmem:[%s2140_s26 + $0xe8] sm:$0xff] %v269_v29   ;;  %v277_v31 = vld [vmem:[%s2135_s25 + $0x1d0] sm:$0xff]   ;;  %v281_v32 = vld [vmem:[%s2135_s25 + $0x1d8] sm:$0xff]  }
  0x22   : > { %274 = vst [vmem:[%s2140_s26 + $0xf0] sm:$0xff] %v273_v30   ;;  %278 = vst [vmem:[%s2140_s26 + $0xf8] sm:$0xff] %v277_v31   ;;  %v285_v33 = vld [vmem:[%s2135_s25 + $0x1e0] sm:$0xff]   ;;  %v289_v34 = vld [vmem:[%s2135_s25 + $0x1e8] sm:$0xff]  }
  0x23   : > { %282 = vst [vmem:[%s2140_s26 + $0x100] sm:$0xff] %v281_v32   ;;  %v293_v35 = vld [vmem:[%s2135_s25 + $0x1f0] sm:$0xff]   ;;  %286 = vst [vmem:[%s2140_s26 + $0x108] sm:$0xff] %v285_v33  }
  0x24   : > { %290 = vst [vmem:[%s2140_s26 + $0x110] sm:$0xff] %v289_v34   ;;  %294 = vst [vmem:[%s2140_s26 + $0x118] sm:$0xff] %v293_v35  }
  0x25 PF: > { %p1560_p5 = scmp.ge.s32.totalorder %s2076_s14, 1  ;;  %p462_p6 = scmp.lt.s32.totalorder %s2076_s14, 3 }
  0x27   : > { %p463_p7 = pnand %p1560_p5, %p462_p6 }
  0x28   : > { %v2016_v36 = vld [vmem:[%s2586_s1] sm:$0xff] (!%p463_p7)   ;;  %v2078_v37 = vmov (!%p463_p7), 0.0   ;;  %v2017_v38 = vld [vmem:[%s2586_s1 + $0x8] sm:$0x1f] (!%p463_p7)   ;;  %vm606_vm0 = vcmask (!%p463_p7), 1043456   ;;  %vm607_vm1 = vcmask (!%p463_p7), 1044480  }
  0x29   : > { %466 = sbr.rel (%p463_p7) target bundleno = 410 (0x19a), region = 69  ;;  %1827 = vmatprep.subr.bf16.mxu0 (!%p463_p7), %v2078_v37  ;;  %1867 = vmatprep.subr.bf16.mxu1 (!%p463_p7), %v2078_v37  ;;  %s469_s4 = sand.u32 (!%p463_p7), 1, %s2068_s12   ;;  %v2079_v39 = vmov (!%p463_p7), 65535   ;;  %vm2080_vm2 = vmmov (!%p463_p7), 0   ;;  %vm578_vm3 = vcmask (!%p463_p7), 203776  }
  0x2a   : > { %1828 = vmatpush3.bf16.msra.mxu0 (!%p463_p7), %v2016_v36  ;;  %1868 = vmatpush3.bf16.msra.mxu1 (!%p463_p7), %v2016_v36  ;;  %v608_v40 = vsel (!%p463_p7), %vm606_vm0, 4294967295, %v2079_v39  ;;  %s1988_s5 = smul.u32 (!%p463_p7), 288, %s469_s4 }
  0x2b   : > { %1829 = vmatprep.subr.bf16.mxu0 (!%p463_p7), %v2078_v37  ;;  %1869 = vmatprep.subr.bf16.mxu1 (!%p463_p7), %v2078_v37  ;;  %v609_v41 = vsel (!%p463_p7), %vm607_vm1, %v608_v40, 0  ;;  %s493_s7 = smul.u32 (!%p463_p7), 18, %s1555_s15 }
  0x2c   : > { %1831 = vmatprep.mubr.msk.bf16.mxu0 (!%p463_p7), %vm2080_vm2, %v2078_v37  ;;  %1871 = vmatprep.mubr.msk.bf16.mxu1 (!%p463_p7), %vm2080_vm2, %v2078_v37  ;;  %v611_v42 = vand.u32 (!%p463_p7), %v2017_v38, %v609_v41  ;;  %s2228_s6 = scalar_lea.vmem (!%p463_p7), [#allocation2], %s1988_s5 }
  0x2d   : > { %v2018_v43 = vld [vmem:[%s2228_s6] sm:$0xff] (!%p463_p7)   ;;  %v2019_v44 = vld [vmem:[%s2228_s6 + $0x48] sm:$0xff] (!%p463_p7)   ;;  %v2021_v46 = vld [vmem:[%s2228_s6 + $0x50] sm:$0xff] (!%p463_p7)   ;;  %p494_p8 = scmp.lt.s32.totalorder (!%p463_p7), %s493_s7, 35 }
  0x2e   : > { %1830 = vmatpush3.bf16.msra.mxu0 (!%p463_p7), %v611_v42  ;;  %1870 = vmatpush3.bf16.msra.mxu1 (!%p463_p7), %v611_v42  ;;  %v2020_v45 = vld [vmem:[%s2228_s6 + $0x8] sm:$0xff] (!%p463_p7)   ;;  %v2022_v47 = vld [vmem:[%s2228_s6 + $0x10] sm:$0xff] (!%p463_p7)   ;;  %v2023_v48 = vld [vmem:[%s2228_s6 + $0x58] sm:$0xff] (!%p463_p7)  }
  0x2f   : > { %1907 = vmatprep.subr.bf16.mxu0 (!%p463_p7), %v2078_v37  ;;  %1947 = vmatprep.subr.bf16.mxu1 (!%p463_p7), %v2078_v37  ;;  %v2024_v49 = vld [vmem:[%s2228_s6 + $0x18] sm:$0xff] (!%p463_p7)   ;;  %v2025_v50 = vld [vmem:[%s2228_s6 + $0x60] sm:$0xff] (!%p463_p7)   ;;  %v2027_v52 = vld [vmem:[%s2228_s6 + $0x68] sm:$0xff] (!%p463_p7)  }
  0x30   : > { %v2026_v51 = vld [vmem:[%s2228_s6 + $0x20] sm:$0xff]   ;;  %v2028_v53 = vld [vmem:[%s2228_s6 + $0x28] sm:$0xff]   ;;  %v2029_v54 = vld [vmem:[%s2228_s6 + $0x70] sm:$0xff]   ;;  %s2596_s7 = smov (!%p494_p8, %s493_s7), 35 }
  0x31   : > { %1832 = vmatmul.mubr.msk.bf16.vlgmr.msra.gmra.mrb[0].mxu0 %vm578_vm3, %v2018_v43  ;;  %1872 = vmatmul.mubr.msk.bf16.vlgmr.msra.gmra.mrb[0].mxu1 %vm578_vm3, %v2019_v44  ;;  %v2030_v55 = vld [vmem:[%s2228_s6 + $0x30] sm:$0xff]   ;;  %v2031_v56 = vld [vmem:[%s2228_s6 + $0x78] sm:$0xff]   ;;  %v2033_v58 = vld [vmem:[%s2228_s6 + $0x80] sm:$0xff]   ;;  %s1561_s10 = sshll.u32 %s2596_s7, 2 }
  0x32   : > { %1908 = vmatpush3.bf16.msra.mxu0 %v2016_v36  ;;  %1948 = vmatpush3.bf16.msra.mxu1 %v2016_v36  ;;  %v2032_v57 = vld [vmem:[%s2228_s6 + $0x38] sm:$0xff]   ;;  %v2034_v59 = vld [vmem:[%s2228_s6 + $0x40] sm:$0xff]   ;;  %v2035_v60 = vld [vmem:[%s2228_s6 + $0x88] sm:$0xff]   ;;  %s2503_s14 = scalar_lea.vmem %s2588_s3, %s1561_s10 }
  0x33   : > { %1835 = vmatprep.mubr.msk.bf16.mxu0 %vm2080_vm2, %v2078_v37  ;;  %1875 = vmatprep.mubr.msk.bf16.mxu1 %vm2080_vm2, %v2078_v37  ;;  %v2036_v61 = vld [vmem:[%s2228_s6 + $0x90] sm:$0xff]   ;;  %v2037_v62 = vld [vmem:[%s2228_s6 + $0xd8] sm:$0xff]   ;;  %v2039_v0 = vld [vmem:[%s2228_s6 + $0xe0] sm:$0xff]  }
  0x34   : > { %1909 = vmatprep.subr.bf16.mxu0 %v2078_v37  ;;  %1949 = vmatprep.subr.bf16.mxu1 %v2078_v37  ;;  %v2038_v63 = vld [vmem:[%s2228_s6 + $0x98] sm:$0xff]   ;;  %v2040_v1 = vld [vmem:[%s2228_s6 + $0xa0] sm:$0xff]   ;;  %v2041_v2 = vld [vmem:[%s2228_s6 + $0xe8] sm:$0xff]  }
  0x35   : > { %v2042_v3 = vld [vmem:[%s2228_s6 + $0xa8] sm:$0xff]   ;;  %v2043_v4 = vld [vmem:[%s2228_s6 + $0xf0] sm:$0xff]   ;;  %v2045_v6 = vld [vmem:[%s2228_s6 + $0xf8] sm:$0xff]  }
  0x36   : > { %1910 = vmatpush3.bf16.msra.mxu0 %v611_v42  ;;  %1950 = vmatpush3.bf16.msra.mxu1 %v611_v42  ;;  %v2044_v5 = vld [vmem:[%s2228_s6 + $0xb0] sm:$0xff]   ;;  %v2046_v7 = vld [vmem:[%s2228_s6 + $0xb8] sm:$0xff]   ;;  %v2047_v8 = vld [vmem:[%s2228_s6 + $0x100] sm:$0xff]  }
  0x37   : > { %v2048_v9 = vld [vmem:[%s2228_s6 + $0xc0] sm:$0xff]   ;;  %v2049_v10 = vld [vmem:[%s2228_s6 + $0x108] sm:$0xff]   ;;  %v2051_v12 = vld [vmem:[%s2228_s6 + $0x110] sm:$0xff]  }
  0x38   : > { %v2050_v11 = vld [vmem:[%s2228_s6 + $0xc8] sm:$0xff]   ;;  %v2052_v13 = vld [vmem:[%s2228_s6 + $0xd0] sm:$0xff]   ;;  %v2053_v14 = vld [vmem:[%s2228_s6 + $0x118] sm:$0xff]  }
  0x39   : > { %1836 = vmatmul.mubr.msk.bf16.gmra.mrb[4].mxu0 %vm578_vm3, %v2020_v45  ;;  %1876 = vmatmul.mubr.msk.bf16.gmra.mrb[4].mxu1 %vm578_vm3, %v2021_v46 }
  0x3a   : > { %1839 = vmatprep.mubr.msk.bf16.mxu0 %vm2080_vm2, %v2078_v37  ;;  %1879 = vmatprep.mubr.msk.bf16.mxu1 %vm2080_vm2, %v2078_v37 }
  0x41   : > { %1840 = vmatmul.mubr.msk.bf16.gmra.mrb[8].mxu0 %vm578_vm3, %v2022_v47  ;;  %1880 = vmatmul.mubr.msk.bf16.gmra.mrb[8].mxu1 %vm578_vm3, %v2023_v48 }
  0x42   : > { %1843 = vmatprep.mubr.msk.bf16.mxu0 %vm2080_vm2, %v2078_v37  ;;  %1883 = vmatprep.mubr.msk.bf16.mxu1 %vm2080_vm2, %v2078_v37 }
  0x49   : > { %1844 = vmatmul.mubr.msk.bf16.gmra.mrb[12].mxu0 %vm578_vm3, %v2024_v49  ;;  %1884 = vmatmul.mubr.msk.bf16.gmra.mrb[12].mxu1 %vm578_vm3, %v2025_v50 }
  0x4a   : > { %1847 = vmatprep.mubr.msk.bf16.mxu0 %vm2080_vm2, %v2078_v37  ;;  %1887 = vmatprep.mubr.msk.bf16.mxu1 %vm2080_vm2, %v2078_v37 }
  0x51   : > { %1848 = vmatmul.mubr.msk.bf16.gmra.mrb[16].mxu0 %vm578_vm3, %v2026_v51  ;;  %1888 = vmatmul.mubr.msk.bf16.gmra.mrb[16].mxu1 %vm578_vm3, %v2027_v52 }
  0x52   : > { %1851 = vmatprep.mubr.msk.bf16.mxu0 %vm2080_vm2, %v2078_v37  ;;  %1891 = vmatprep.mubr.msk.bf16.mxu1 %vm2080_vm2, %v2078_v37 }
  0x59   : > { %1852 = vmatmul.mubr.msk.bf16.gmra.mrb[20].mxu0 %vm578_vm3, %v2028_v53  ;;  %1892 = vmatmul.mubr.msk.bf16.gmra.mrb[20].mxu1 %vm578_vm3, %v2029_v54 }
  0x5a   : > { %1855 = vmatprep.mubr.msk.bf16.mxu0 %vm2080_vm2, %v2078_v37  ;;  %1895 = vmatprep.mubr.msk.bf16.mxu1 %vm2080_vm2, %v2078_v37 }
  0x61   : > { %1856 = vmatmul.mubr.msk.bf16.gmra.mrb[24].mxu0 %vm578_vm3, %v2030_v55  ;;  %1896 = vmatmul.mubr.msk.bf16.gmra.mrb[24].mxu1 %vm578_vm3, %v2031_v56 }
  0x62   : > { %1859 = vmatprep.mubr.msk.bf16.mxu0 %vm2080_vm2, %v2078_v37  ;;  %1899 = vmatprep.mubr.msk.bf16.mxu1 %vm2080_vm2, %v2078_v37 }
  0x69   : > { %1860 = vmatmul.mubr.msk.bf16.gmra.mrb[28].mxu0 %vm578_vm3, %v2032_v57  ;;  %1900 = vmatmul.mubr.msk.bf16.gmra.mrb[28].mxu1 %vm578_vm3, %v2033_v58 }
  0x6a   : > { %1863 = vmatprep.mubr.msk.bf16.mxu0 %vm2080_vm2, %v2078_v37  ;;  %1903 = vmatprep.mubr.msk.bf16.mxu1 %vm2080_vm2, %v2078_v37 }
  0x71   : > { %1864 = vmatmul.mubr.msk.bf16.gmra.mrb[32].mxu0 %vm578_vm3, %v2034_v59  ;;  %1904 = vmatmul.mubr.msk.bf16.gmra.mrb[32].mxu1 %vm578_vm3, %v2035_v60 }
  0x72   : > { %1911 = vmatprep.mubr.msk.bf16.mxu0 %vm2080_vm2, %v2078_v37  ;;  %1951 = vmatprep.mubr.msk.bf16.mxu1 %vm2080_vm2, %v2078_v37 }
  0x79   : > { %1912 = vmatmul.mubr.msk.bf16.vlgmr.msra.gmra.mrb[36].mxu0 %vm578_vm3, %v2036_v61  ;;  %1952 = vmatmul.mubr.msk.bf16.vlgmr.msra.gmra.mrb[36].mxu1 %vm578_vm3, %v2037_v62 }
  0x7a   : > { %1915 = vmatprep.mubr.msk.bf16.mxu0 %vm2080_vm2, %v2078_v37  ;;  %1955 = vmatprep.mubr.msk.bf16.mxu1 %vm2080_vm2, %v2078_v37 }
  0x81   : > { %1916 = vmatmul.mubr.msk.bf16.gmra.mrb[40].mxu0 %vm578_vm3, %v2038_v63  ;;  %1956 = vmatmul.mubr.msk.bf16.gmra.mrb[40].mxu1 %vm578_vm3, %v2039_v0 }
  0x82   : > { %1919 = vmatprep.mubr.msk.bf16.mxu0 %vm2080_vm2, %v2078_v37  ;;  %1959 = vmatprep.mubr.msk.bf16.mxu1 %vm2080_vm2, %v2078_v37 }
  0x89   : > { %1920 = vmatmul.mubr.msk.bf16.gmra.mrb[44].mxu0 %vm578_vm3, %v2040_v1  ;;  %1960 = vmatmul.mubr.msk.bf16.gmra.mrb[44].mxu1 %vm578_vm3, %v2041_v2 }
  0x8a   : > { %1923 = vmatprep.mubr.msk.bf16.mxu0 %vm2080_vm2, %v2078_v37  ;;  %1963 = vmatprep.mubr.msk.bf16.mxu1 %vm2080_vm2, %v2078_v37 }
  0x91   : > { %1924 = vmatmul.mubr.msk.bf16.gmra.mrb[48].mxu0 %vm578_vm3, %v2042_v3  ;;  %1964 = vmatmul.mubr.msk.bf16.gmra.mrb[48].mxu1 %vm578_vm3, %v2043_v4 }
  0x92   : > { %1927 = vmatprep.mubr.msk.bf16.mxu0 %vm2080_vm2, %v2078_v37  ;;  %1967 = vmatprep.mubr.msk.bf16.mxu1 %vm2080_vm2, %v2078_v37 }
  0x99   : > { %1928 = vmatmul.mubr.msk.bf16.gmra.mrb[52].mxu0 %vm578_vm3, %v2044_v5  ;;  %1968 = vmatmul.mubr.msk.bf16.gmra.mrb[52].mxu1 %vm578_vm3, %v2045_v6 }
  0x9a   : > { %1931 = vmatprep.mubr.msk.bf16.mxu0 %vm2080_vm2, %v2078_v37  ;;  %1971 = vmatprep.mubr.msk.bf16.mxu1 %vm2080_vm2, %v2078_v37 }
  0xa1   : > { %1932 = vmatmul.mubr.msk.bf16.gmra.mrb[56].mxu0 %vm578_vm3, %v2046_v7  ;;  %1972 = vmatmul.mubr.msk.bf16.gmra.mrb[56].mxu1 %vm578_vm3, %v2047_v8 }
  0xa2   : > { %1935 = vmatprep.mubr.msk.bf16.mxu0 %vm2080_vm2, %v2078_v37  ;;  %1975 = vmatprep.mubr.msk.bf16.mxu1 %vm2080_vm2, %v2078_v37 }
  0xa9   : > { %1936 = vmatmul.mubr.msk.bf16.gmra.mrb[60].mxu0 %vm578_vm3, %v2048_v9  ;;  %1976 = vmatmul.mubr.msk.bf16.gmra.mrb[60].mxu1 %vm578_vm3, %v2049_v10 }
  0xaa   : > { %1939 = vmatprep.mubr.msk.bf16.mxu0 %vm2080_vm2, %v2078_v37  ;;  %1979 = vmatprep.mubr.msk.bf16.mxu1 %vm2080_vm2, %v2078_v37 }
  0xb1   : > { %1940 = vmatmul.mubr.msk.bf16.gmra.mrb[64].mxu0 %vm578_vm3, %v2050_v11  ;;  %1980 = vmatmul.mubr.msk.bf16.gmra.mrb[64].mxu1 %vm578_vm3, %v2051_v12 }
  0xb2   : > { %1943 = vmatprep.mubr.msk.bf16.mxu0 %vm2080_vm2, %v2078_v37  ;;  %1983 = vmatprep.mubr.msk.bf16.mxu1 %vm2080_vm2, %v2078_v37 }
  0xb9   : > { %1944 = vmatmul.mubr.msk.bf16.gmra.mrb[68].mxu0 %vm578_vm3, %v2052_v13  ;;  %1984 = vmatmul.mubr.msk.bf16.gmra.mrb[68].mxu1 %vm578_vm3, %v2053_v14 }
 0x104   : > { %v2374_v15 = vpop.f32.mrb[0].mxu0  ;;  %v2376_v16 = vpop.f32.mrb[0].mxu1 }
 0x105   : > { %v914_v17 = vmax.f32 %v2374_v15, %v2376_v16  ;;  %v1833_v18 = vpop.f32.mrb[1].mxu0  ;;  %v1873_v19 = vpop.f32.mrb[1].mxu1 }
 0x106   : > { %v2380_v20 = vpop.f32.mrb[2].mxu0  ;;  %v2382_v21 = vpop.f32.mrb[2].mxu1 }
 0x107   : > { %v915_v22 = vmax.f32 %v2380_v20, %v2382_v21  ;;  %v1834_v23 = vpop.f32.mrb[3].mxu0  ;;  %v1874_v24 = vpop.f32.mrb[3].mxu1 }
 0x10c   : > { %v2386_v25 = vpop.f32.mrb[4].mxu0  ;;  %v2388_v26 = vpop.f32.mrb[4].mxu1 }
 0x10d   : > { %v916_v27 = vmax.f32 %v2386_v25, %v2388_v26  ;;  %v1837_v28 = vpop.f32.mrb[5].mxu0  ;;  %v1877_v29 = vpop.f32.mrb[5].mxu1 }
 0x10e   : > { %v2392_v30 = vpop.f32.mrb[6].mxu0  ;;  %v2394_v31 = vpop.f32.mrb[6].mxu1 }
 0x10f   : > { %v917_v32 = vmax.f32 %v2392_v30, %v2394_v31  ;;  %v1838_v33 = vpop.f32.mrb[7].mxu0  ;;  %v1878_v34 = vpop.f32.mrb[7].mxu1 }
 0x114   : > { %v2398_v35 = vpop.f32.mrb[8].mxu0  ;;  %v2400_v36 = vpop.f32.mrb[8].mxu1 }
 0x115   : > { %v918_v37 = vmax.f32 %v2398_v35, %v2400_v36  ;;  %v1841_v38 = vpop.f32.mrb[9].mxu0  ;;  %v1881_v39 = vpop.f32.mrb[9].mxu1 }
 0x116   : > { %v2404_v40 = vpop.f32.mrb[10].mxu0  ;;  %v2406_v41 = vpop.f32.mrb[10].mxu1 }
 0x117   : > { %v919_v42 = vmax.f32 %v2404_v40, %v2406_v41  ;;  %v1842_v43 = vpop.f32.mrb[11].mxu0  ;;  %v1882_v44 = vpop.f32.mrb[11].mxu1 }
 0x11c   : > { %v2410_v45 = vpop.f32.mrb[12].mxu0  ;;  %v2412_v46 = vpop.f32.mrb[12].mxu1 }
 0x11d   : > { %v920_v47 = vmax.f32 %v2410_v45, %v2412_v46  ;;  %v1845_v48 = vpop.f32.mrb[13].mxu0  ;;  %v1885_v49 = vpop.f32.mrb[13].mxu1 }
 0x11e   : > { %v2416_v50 = vpop.f32.mrb[14].mxu0  ;;  %v2418_v51 = vpop.f32.mrb[14].mxu1 }
 0x11f   : > { %v921_v52 = vmax.f32 %v2416_v50, %v2418_v51  ;;  %v1846_v53 = vpop.f32.mrb[15].mxu0  ;;  %v1886_v54 = vpop.f32.mrb[15].mxu1 }
 0x124   : > { %v2422_v55 = vpop.f32.mrb[16].mxu0  ;;  %v2424_v56 = vpop.f32.mrb[16].mxu1 }
 0x125   : > { %v922_v57 = vmax.f32 %v2422_v55, %v2424_v56  ;;  %v1849_v58 = vpop.f32.mrb[17].mxu0  ;;  %v1889_v59 = vpop.f32.mrb[17].mxu1 }
 0x126   : > { %v2428_v60 = vpop.f32.mrb[18].mxu0  ;;  %v2430_v61 = vpop.f32.mrb[18].mxu1 }
 0x127   : > { %v923_v62 = vmax.f32 %v2428_v60, %v2430_v61  ;;  %v1850_v63 = vpop.f32.mrb[19].mxu0  ;;  %v1890_v0 = vpop.f32.mrb[19].mxu1 }
 0x12c   : > { %v2434_v1 = vpop.f32.mrb[20].mxu0  ;;  %v2436_v2 = vpop.f32.mrb[20].mxu1 }
 0x12d   : > { %v924_v3 = vmax.f32 %v2434_v1, %v2436_v2  ;;  %v1853_v4 = vpop.f32.mrb[21].mxu0  ;;  %v1893_v5 = vpop.f32.mrb[21].mxu1 }
 0x12e   : > { %v2440_v6 = vpop.f32.mrb[22].mxu0  ;;  %v2442_v7 = vpop.f32.mrb[22].mxu1 }
 0x12f   : > { %v925_v8 = vmax.f32 %v2440_v6, %v2442_v7  ;;  %v1854_v9 = vpop.f32.mrb[23].mxu0  ;;  %v1894_v10 = vpop.f32.mrb[23].mxu1 }
 0x134   : > { %v2446_v11 = vpop.f32.mrb[24].mxu0  ;;  %v2448_v12 = vpop.f32.mrb[24].mxu1 }
 0x135   : > { %v926_v13 = vmax.f32 %v2446_v11, %v2448_v12  ;;  %v1857_v14 = vpop.f32.mrb[25].mxu0  ;;  %v1897_v18 = vpop.f32.mrb[25].mxu1 }
 0x136   : > { %v2452_v19 = vpop.f32.mrb[26].mxu0  ;;  %v2454_v23 = vpop.f32.mrb[26].mxu1 }
 0x137   : > { %v927_v24 = vmax.f32 %v2452_v19, %v2454_v23  ;;  %v1858_v28 = vpop.f32.mrb[27].mxu0  ;;  %v1898_v29 = vpop.f32.mrb[27].mxu1 }
 0x13c   : > { %v2458_v33 = vpop.f32.mrb[28].mxu0  ;;  %v2460_v34 = vpop.f32.mrb[28].mxu1 }
 0x13d   : > { %v928_v38 = vmax.f32 %v2458_v33, %v2460_v34  ;;  %v1861_v39 = vpop.f32.mrb[29].mxu0  ;;  %v1901_v43 = vpop.f32.mrb[29].mxu1 }
 0x13e   : > { %v2464_v44 = vpop.f32.mrb[30].mxu0  ;;  %v2466_v48 = vpop.f32.mrb[30].mxu1 }
 0x13f   : > { %v1862_v53 = vpop.f32.mrb[31].mxu0  ;;  %v1902_v54 = vpop.f32.mrb[31].mxu1 }
 0x140   : > { %v2490_v54 = vld [vmem:[%s2587_s2] ss:$0 sm:$0xff] }
 0x144   : > { %v2470_v58 = vpop.f32.mrb[32].mxu0  ;;  %v2472_v59 = vpop.f32.mrb[32].mxu1 }
 0x145   : > { %v1865_v0 = vpop.f32.mrb[33].mxu0  ;;  %v1905_v4 = vpop.f32.mrb[33].mxu1 }
 0x146   : > { %v2476_v5 = vpop.f32.mrb[34].mxu0  ;;  %v2478_v9 = vpop.f32.mrb[34].mxu1 }
 0x147   : > { %v1866_v14 = vpop.f32.mrb[35].mxu0  ;;  %v1906_v18 = vpop.f32.mrb[35].mxu1 }
 0x14c   : > { %v1057_v28 = vpop.f32.mrb[36].mxu0  ;;  %v1271_v29 = vpop.f32.mrb[36].mxu1 }
 0x14d   : > { %v1128_v39 = vmax.f32 %v914_v17, %v1057_v28  ;;  %v1913_v43 = vpop.f32.mrb[37].mxu0  ;;  %v1953_v53 = vpop.f32.mrb[37].mxu1 }
 0x14e   : > { %v1060_v0 = vpop.f32.mrb[38].mxu0  ;;  %v1274_v4 = vpop.f32.mrb[38].mxu1 }
 0x14f   : > { %v1342_v14 = vmax.f32 %v1128_v39, %v1271_v29  ;;  %v1129_v18 = vmax.f32 %v915_v22, %v1060_v0  ;;  %v1914_v10 = vpop.f32.mrb[39].mxu0  ;;  %v1954_v63 = vpop.f32.mrb[39].mxu1 }
 0x151   : > { %v1367_v15 = vadd.f32 %v2490_v54, %v1342_v14  ;;  %v1343_v16 = vmax.f32 %v1129_v18, %v1274_v4 }
 0x153   : > { %v1368_v17 = vadd.f32 %v2490_v54, %v1343_v16  ;;  %v1385_v53 = vmax.f32 %v1367_v15, 0.0 }
 0x154   : > { %v1065_v28 = vpop.f32.mrb[40].mxu0  ;;  %v1279_v43 = vpop.f32.mrb[40].mxu1 }
 0x155   : > { %v1386_v49 = vmax.f32 %v1368_v17, 0.0  ;;  %v1130_v29 = vmax.f32 %v916_v27, %v1065_v28  ;;  %v1917_v39 = vpop.f32.mrb[41].mxu0  ;;  %v1957_v20 = vpop.f32.mrb[41].mxu1 }
 0x156   : > { %v1068_v21 = vpop.f32.mrb[42].mxu0  ;;  %v1282_v22 = vpop.f32.mrb[42].mxu1 }
 0x157   : > { %v1733_v63 = vpack.c.bf16 %v1386_v49, %v1385_v53  ;;  %v1344_v10 = vmax.f32 %v1130_v29, %v1279_v43  ;;  %v1131_v0 = vmax.f32 %v917_v32, %v1068_v21  ;;  %v1918_v4 = vpop.f32.mrb[43].mxu0  ;;  %v1958_v14 = vpop.f32.mrb[43].mxu1 }
 0x159   : > { %1734 = vst [vmem:[%s2503_s14] sm:$0xff] %v1733_v63   ;;  %v1369_v25 = vadd.f32 %v2490_v54, %v1344_v10  ;;  %v1345_v26 = vmax.f32 %v1131_v0, %v1282_v22 }
 0x15b   : > { %v1370_v27 = vadd.f32 %v2490_v54, %v1345_v26  ;;  %v1387_v16 = vmax.f32 %v1369_v25, 0.0 }
 0x15c   : > { %v1073_v18 = vpop.f32.mrb[44].mxu0  ;;  %v1287_v15 = vpop.f32.mrb[44].mxu1 }
 0x15d   : > { %v1388_v17 = vmax.f32 %v1370_v27, 0.0  ;;  %v1132_v49 = vmax.f32 %v918_v37, %v1073_v18  ;;  %v1921_v28 = vpop.f32.mrb[45].mxu0  ;;  %v1961_v30 = vpop.f32.mrb[45].mxu1 }
 0x15e   : > { %v1076_v31 = vpop.f32.mrb[46].mxu0  ;;  %v1290_v32 = vpop.f32.mrb[46].mxu1 }
 0x15f   : > { %v1738_v43 = vpack.c.bf16 %v1388_v17, %v1387_v16  ;;  %v1346_v53 = vmax.f32 %v1132_v49, %v1287_v15  ;;  %v1133_v29 = vmax.f32 %v919_v42, %v1076_v31  ;;  %v1922_v39 = vpop.f32.mrb[47].mxu0  ;;  %v1962_v20 = vpop.f32.mrb[47].mxu1 }
 0x161   : > { %1775 = vst [vmem:[%s2503_s14 + $0x8] sm:$0xff] %v1738_v43   ;;  %v1371_v21 = vadd.f32 %v2490_v54, %v1346_v53  ;;  %v1347_v22 = vmax.f32 %v1133_v29, %v1290_v32 }
 0x163   : > { %v1372_v35 = vadd.f32 %v2490_v54, %v1347_v22  ;;  %v1389_v63 = vmax.f32 %v1371_v21, 0.0 }
 0x164   : > { %v1081_v36 = vpop.f32.mrb[48].mxu0  ;;  %v1295_v37 = vpop.f32.mrb[48].mxu1 }
 0x165   : > { %v1390_v10 = vmax.f32 %v1372_v35, 0.0  ;;  %v1134_v0 = vmax.f32 %v920_v47, %v1081_v36  ;;  %v1925_v4 = vpop.f32.mrb[49].mxu0  ;;  %v1965_v40 = vpop.f32.mrb[49].mxu1 }
 0x166   : > { %v1084_v41 = vpop.f32.mrb[50].mxu0  ;;  %v1298_v42 = vpop.f32.mrb[50].mxu1 }
 0x167   : > { %v1743_v14 = vpack.c.bf16 %v1390_v10, %v1389_v63  ;;  %v1348_v25 = vmax.f32 %v1134_v0, %v1295_v37  ;;  %v1135_v26 = vmax.f32 %v921_v52, %v1084_v41  ;;  %v1926_v27 = vpop.f32.mrb[51].mxu0  ;;  %v1966_v18 = vpop.f32.mrb[51].mxu1 }
 0x169   : > { %1776 = vst [vmem:[%s2503_s14 + $0x10] sm:$0xff] %v1743_v14   ;;  %v1373_v15 = vadd.f32 %v2490_v54, %v1348_v25  ;;  %v1349_v16 = vmax.f32 %v1135_v26, %v1298_v42 }
 0x16b   : > { %v1374_v45 = vadd.f32 %v2490_v54, %v1349_v16  ;;  %v1391_v17 = vmax.f32 %v1373_v15, 0.0 }
 0x16c   : > { %v1089_v46 = vpop.f32.mrb[52].mxu0  ;;  %v1303_v47 = vpop.f32.mrb[52].mxu1 }
 0x16d   : > { %v1392_v49 = vmax.f32 %v1374_v45, 0.0  ;;  %v1136_v28 = vmax.f32 %v922_v57, %v1089_v46  ;;  %v1929_v30 = vpop.f32.mrb[53].mxu0  ;;  %v1969_v50 = vpop.f32.mrb[53].mxu1 }
 0x16e   : > { %v1092_v51 = vpop.f32.mrb[54].mxu0  ;;  %v1306_v52 = vpop.f32.mrb[54].mxu1 }
 0x16f   : > { %v1748_v31 = vpack.c.bf16 %v1392_v49, %v1391_v17  ;;  %v1350_v32 = vmax.f32 %v1136_v28, %v1303_v47  ;;  %v1137_v43 = vmax.f32 %v923_v62, %v1092_v51  ;;  %v1930_v53 = vpop.f32.mrb[55].mxu0  ;;  %v1970_v29 = vpop.f32.mrb[55].mxu1 }
 0x171   : > { %1777 = vst [vmem:[%s2503_s14 + $0x18] sm:$0xff] %v1748_v31   ;;  %v1375_v39 = vadd.f32 %v2490_v54, %v1350_v32  ;;  %v1351_v20 = vmax.f32 %v1137_v43, %v1306_v52  ;;  %v2589_v52 = vmax.f32 %v2464_v44, %v2466_v48 }
 0x173   : > { %v1376_v55 = vadd.f32 %v2490_v54, %v1351_v20  ;;  %v1393_v21 = vmax.f32 %v1375_v39, 0.0 }
 0x174   : > { %v1097_v56 = vpop.f32.mrb[56].mxu0  ;;  %v1311_v57 = vpop.f32.mrb[56].mxu1 }
 0x175   : > { %v1394_v22 = vmax.f32 %v1376_v55, 0.0  ;;  %v1138_v35 = vmax.f32 %v924_v3, %v1097_v56  ;;  %v1933_v36 = vpop.f32.mrb[57].mxu0  ;;  %v1973_v60 = vpop.f32.mrb[57].mxu1  ;;  %v2590_v55 = vmax.f32 %v2470_v58, %v2472_v59 }
 0x176   : > { %v1100_v61 = vpop.f32.mrb[58].mxu0  ;;  %v1314_v62 = vpop.f32.mrb[58].mxu1  ;;  %v2591_v36 = vmax.f32 %v2476_v5, %v2478_v9 }
 0x177   : > { %v1753_v37 = vpack.c.bf16 %v1394_v22, %v1393_v21  ;;  %v1352_v63 = vmax.f32 %v1138_v35, %v1311_v57  ;;  %v1139_v10 = vmax.f32 %v925_v8, %v1100_v61  ;;  %v1934_v0 = vpop.f32.mrb[59].mxu0  ;;  %v1974_v4 = vpop.f32.mrb[59].mxu1 }
 0x179   : > { %1778 = vst [vmem:[%s2503_s14 + $0x20] sm:$0xff] %v1753_v37   ;;  %v1377_v40 = vadd.f32 %v2490_v54, %v1352_v63  ;;  %v1353_v41 = vmax.f32 %v1139_v10, %v1314_v62 }
 0x17b   : > { %v1378_v1 = vadd.f32 %v2490_v54, %v1353_v41  ;;  %v1395_v42 = vmax.f32 %v1377_v40, 0.0 }
 0x17c   : > { %v1105_v2 = vpop.f32.mrb[60].mxu0  ;;  %v1319_v3 = vpop.f32.mrb[60].mxu1 }
 0x17d   : > { %v1396_v14 = vmax.f32 %v1378_v1, 0.0  ;;  %v1140_v25 = vmax.f32 %v926_v13, %v1105_v2  ;;  %v1937_v26 = vpop.f32.mrb[61].mxu0  ;;  %v1977_v6 = vpop.f32.mrb[61].mxu1 }
 0x17e   : > { %v1108_v7 = vpop.f32.mrb[62].mxu0  ;;  %v1322_v8 = vpop.f32.mrb[62].mxu1 }
 0x17f   : > { %v1758_v27 = vpack.c.bf16 %v1396_v14, %v1395_v42  ;;  %v1354_v18 = vmax.f32 %v1140_v25, %v1319_v3  ;;  %v1141_v15 = vmax.f32 %v927_v24, %v1108_v7  ;;  %v1938_v16 = vpop.f32.mrb[63].mxu0  ;;  %v1978_v45 = vpop.f32.mrb[63].mxu1 }
 0x181   : > { %1779 = vst [vmem:[%s2503_s14 + $0x28] sm:$0xff] %v1758_v27   ;;  %v1379_v46 = vadd.f32 %v2490_v54, %v1354_v18  ;;  %v1355_v47 = vmax.f32 %v1141_v15, %v1322_v8 }
 0x183   : > { %v1380_v11 = vadd.f32 %v2490_v54, %v1355_v47  ;;  %v1397_v17 = vmax.f32 %v1379_v46, 0.0 }
 0x184   : > { %v1113_v12 = vpop.f32.mrb[64].mxu0  ;;  %v1327_v13 = vpop.f32.mrb[64].mxu1 }
 0x185   : > { %v1398_v49 = vmax.f32 %v1380_v11, 0.0  ;;  %v1142_v28 = vmax.f32 %v928_v38, %v1113_v12  ;;  %v1941_v30 = vpop.f32.mrb[65].mxu0  ;;  %v1981_v19 = vpop.f32.mrb[65].mxu1 }
 0x186   : > { %v1116_v23 = vpop.f32.mrb[66].mxu0  ;;  %v1330_v24 = vpop.f32.mrb[66].mxu1 }
 0x187   : > { %v1763_v50 = vpack.c.bf16 %v1398_v49, %v1397_v17  ;;  %v1356_v51 = vmax.f32 %v1142_v28, %v1327_v13  ;;  %v1143_v31 = vmax.f32 %v2589_v52, %v1116_v23  ;;  %v1942_v32 = vpop.f32.mrb[67].mxu0  ;;  %v1982_v43 = vpop.f32.mrb[67].mxu1 }
 0x189   : > { %1780 = vst [vmem:[%s2503_s14 + $0x30] sm:$0xff] %v1763_v50   ;;  %v1381_v53 = vadd.f32 %v2490_v54, %v1356_v51  ;;  %v1357_v29 = vmax.f32 %v1143_v31, %v1330_v24 }
 0x18b   : > { %v1382_v33 = vadd.f32 %v2490_v54, %v1357_v29  ;;  %v1399_v39 = vmax.f32 %v1381_v53, 0.0 }
 0x18c   : > { %v1121_v34 = vpop.f32.mrb[68].mxu0  ;;  %v1335_v38 = vpop.f32.mrb[68].mxu1 }
 0x18d   : > { %v1400_v20 = vmax.f32 %v1382_v33, 0.0  ;;  %v1144_v56 = vmax.f32 %v2590_v55, %v1121_v34  ;;  %v1945_v57 = vpop.f32.mrb[69].mxu0  ;;  %v1985_v44 = vpop.f32.mrb[69].mxu1 }
 0x18e   : > { %v1124_v48 = vpop.f32.mrb[70].mxu0  ;;  %v1338_v21 = vpop.f32.mrb[70].mxu1 }
 0x18f   : > { %v1768_v22 = vpack.c.bf16 %v1400_v20, %v1399_v39  ;;  %v1358_v35 = vmax.f32 %v1144_v56, %v1335_v38  ;;  %v1145_v60 = vmax.f32 %v2591_v36, %v1124_v48  ;;  %v1946_v61 = vpop.f32.mrb[71].mxu0  ;;  %v1986_v62 = vpop.f32.mrb[71].mxu1 }
 0x191   : > { %1781 = vst [vmem:[%s2503_s14 + $0x38] sm:$0xff] %v1768_v22   ;;  %v1383_v37 = vadd.f32 %v2490_v54, %v1358_v35  ;;  %v1359_v63 = vmax.f32 %v1145_v60, %v1338_v21 }
 0x193   : > { %v1384_v58 = vadd.f32 %v2490_v54, %v1359_v63  ;;  %v1401_v59 = vmax.f32 %v1383_v37, 0.0 }
 0x195   : > { %v1402_v10 = vmax.f32 %v1384_v58, 0.0 }
 0x197   : > { %v1773_v0 = vpack.c.bf16 %v1402_v10, %v1401_v59 }
 0x199   : > { %1782 = vst [vmem:[%s2503_s14 + $0x40] sm:$0xff] %v1773_v0  }
 0x19a PF: > { %p10_p9 = scmp.ge.s32.totalorder %s2118_s16, 4   ;;  %s2592_s12 = smov %s2072_s13 }
 0x19b   : > { %s2593_s13 = smov %s2127_s19  ;;  %s2594_s14 = smov %s2118_s16 }
 0x19c   :  { %12 = sbr.rel (!%p10_p9) target bundleno = 2 (0x2), region = 111 }

// kernel: submodel_forward.3
= control target key start
LH: loop header
LB: loop body
LE: loop exit
PB: predicated region body
PF: predicated region fallthrough
CT: control target
= control target key end

     0   :  { %s913_s12 = smov 0   ;;  %s915_s13 = smov 0   ;;  %s1058_s0 = inlined_call_operand.vmem [shape: bf16[4,32,250], index: 0, kind: input, shape index: {}]   ;;  %s1059_s1 = inlined_call_operand.vmem [shape: bf16[250,128], index: 1, kind: input, shape index: {}]   ;;  %s1060_s2 = inlined_call_operand.vmem [shape: f32[1,128], index: 2, kind: input, shape index: {}]   ;;  %s1061_s3 = inlined_call_operand.vmem [shape: f32[32,128], index: 3, kind: output, shape index: {}]  }
   0x1   :  { %s917_s14 = smov 0  }
   0x2 LB: > { %s674_s15 = sadd.s32 4294967295, %s891_s14   ;;  %s930_s16 = sadd.s32 1, %s891_s14   ;;  %s891_s14 = sphi %s917_s14, %s1064_s14   ;;  %s887_s13 = sphi %s915_s13, %s1063_s13   ;;  %s883_s12 = sphi %s913_s12, %s1062_s12  }
   0x3   : > { %s17_s17 = ssub.s32 %s891_s14, %s930_s16  ;;  %s20_s18 = sadd.s32 1, %s887_s13 }
   0x4   : > { %p18_p0 = scmp.eq.s32.totalorder %s17_s17, 0  ;;  %p27_p1 = scmp.ne.s32.totalorder %s887_s13, %s883_s12 }
   0x5   : > { %p28_p2 = scmp.eq.s32.totalorder %s891_s14, 0  ;;  %p677_p4 = scmp.ge.s32.totalorder %s891_s14, 2 }
   0x6   : > { %s939_s19 = scalar_select %p18_p0, %s887_s13, %s20_s18  }
   0x7   : > { %p29_p3 = por %p28_p2, %p27_p1  ;;  %127 = sbr.rel (%p677_p4) target bundleno = 22 (0x16), region = 24 }
   0xe   : > { %130 = sbr.rel (!%p29_p3) target bundleno = 22 (0x16), region = 28  ;;  %s132_s20 = sand.u32 (%p29_p3), 1, %s887_s13  }
   0xf   : > { %s724_s21 = sshll.u32 (%p29_p3), %s891_s14, 4  ;;  %s678_s22 = sshll.u32 (%p29_p3), %s132_s20, 6 }
  0x10   : > { %s138_s25 = scalar_lea.vmem (%p29_p3), %s1058_s0, %s724_s21  ;;  %s134_s26 = scalar_lea.vmem (%p29_p3), [#allocation2], %s678_s22 }
  0x11   : > { %v180_v0 = vld [vmem:[%s138_s25] sm:$0xff] (%p29_p3)  ;;  %v182_v1 = vld [vmem:[%s138_s25 + $0x8] sm:$0xff] (%p29_p3) }
  0x12   : > { %v184_v2 = vld [vmem:[%s138_s25 + $0x20] sm:$0xff] (%p29_p3)  ;;  %181 = vst [vmem:[%s134_s26] sm:$0xff] (%p29_p3), %v180_v0  ;;  %183 = vst [vmem:[%s134_s26 + $0x8] sm:$0xff] (%p29_p3), %v182_v1  ;;  %v186_v3 = vld [vmem:[%s138_s25 + $0x28] sm:$0xff] (%p29_p3) }
  0x13   : > { %185 = vst [vmem:[%s134_s26 + $0x10] sm:$0xff] (%p29_p3), %v184_v2  ;;  %v188_v4 = vld [vmem:[%s138_s25 + $0x40] sm:$0xff] (%p29_p3)  ;;  %v190_v5 = vld [vmem:[%s138_s25 + $0x48] sm:$0xff] (%p29_p3)  ;;  %187 = vst [vmem:[%s134_s26 + $0x18] sm:$0xff] (%p29_p3), %v186_v3 }
  0x14   : > { %189 = vst [vmem:[%s134_s26 + $0x20] sm:$0xff] (%p29_p3), %v188_v4  ;;  %191 = vst [vmem:[%s134_s26 + $0x28] sm:$0xff] (%p29_p3), %v190_v5  ;;  %v192_v6 = vld [vmem:[%s138_s25 + $0x60] sm:$0xff] (%p29_p3)  ;;  %v194_v7 = vld [vmem:[%s138_s25 + $0x68] sm:$0xff] (%p29_p3) }
  0x15   : > { %193 = vst [vmem:[%s134_s26 + $0x30] sm:$0xff] %v192_v6  ;;  %195 = vst [vmem:[%s134_s26 + $0x38] sm:$0xff] %v194_v7 }
  0x16 PF: > { %p682_p5 = scmp.ge.s32.totalorder %s891_s14, 1  ;;  %p200_p6 = scmp.lt.s32.totalorder %s891_s14, 3 }
  0x18   : > { %p201_p7 = pnand %p682_p5, %p200_p6 }
  0x19   : > { %v841_v8 = vld [vmem:[%s1059_s1 + $0x40] sm:$0xff] (!%p201_p7)   ;;  %v960_v10 = vld [vmem:[%s1059_s1 + $0x48] sm:$0xff] (!%p201_p7)   ;;  %v974_v12 = vld [vmem:[%s1059_s1 + $0x50] sm:$0xff] (!%p201_p7)   ;;  %s207_s20 = sand.u32 (!%p201_p7), 1, %s883_s12   ;;  %vm376_vm0 = vcmask (!%p201_p7), 998400   ;;  %vm380_vm1 = vcmask (!%p201_p7), 1044480  }
  0x1a   : > { %204 = sbr.rel (%p201_p7) target bundleno = 316 (0x13c), region = 66  ;;  %v955_v9 = vld [vmem:[%s1059_s1] sm:$0xff] (!%p201_p7)   ;;  %725 = vmatprep.subr.bf16.mxu0 (!%p201_p7), %v841_v8  ;;  %747 = vmatprep.subr.bf16.mxu1 (!%p201_p7), %v841_v8  ;;  %v967_v11 = vld [vmem:[%s1059_s1 + $0x8] sm:$0xff] (!%p201_p7)   ;;  %v846_v13 = vld [vmem:[%s1059_s1 + $0x10] sm:$0xff] (!%p201_p7)   ;;  %s683_s23 = sshll.u32 (!%p201_p7), %s207_s20, 6 }
  0x1b   : > { %726 = vmatpush3.bf16.msra.mxu0 (!%p201_p7), %v955_v9  ;;  %748 = vmatpush3.bf16.msra.mxu1 (!%p201_p7), %v955_v9  ;;  %v847_v14 = vld [vmem:[%s1059_s1 + $0x58] sm:$0xff] (!%p201_p7)   ;;  %v849_v16 = vld [vmem:[%s1059_s1 + $0x60] sm:$0xff] (!%p201_p7)   ;;  %v851_v18 = vld [vmem:[%s1059_s1 + $0x68] sm:$0xff] (!%p201_p7)   ;;  %s999_s29 = scalar_lea.vmem (!%p201_p7), [#allocation2], %s683_s23  ;;  %s684_s18 = sshll.u32 (!%p201_p7), %s674_s15, 1 }
  0x1c   : > { %727 = vmatprep.subr.bf16.mxu0 (!%p201_p7), %v960_v10  ;;  %749 = vmatprep.subr.bf16.mxu1 (!%p201_p7), %v960_v10  ;;  %v848_v15 = vld [vmem:[%s1059_s1 + $0x18] sm:$0xff] (!%p201_p7)   ;;  %v850_v17 = vld [vmem:[%s1059_s1 + $0x20] sm:$0xff] (!%p201_p7)   ;;  %v852_v21 = vld [vmem:[%s1059_s1 + $0x28] sm:$0xff] (!%p201_p7)   ;;  %p232_p8 = scmp.lt.s32.totalorder (!%p201_p7), %s684_s18, 3 }
  0x1d   : > { %v859_v19 = vld [vmem:[%s999_s29 + $0x4] ss:$8 sps:$4 sm:$0xff] (!%p201_p7)   ;;  %v862_v20 = vld [vmem:[%s999_s29 + $0x14] ss:$8 sps:$4 sm:$0xff] (!%p201_p7)   ;;  %v857_v26 = vld [vmem:[%s999_s29] ss:$8 sps:$4 sm:$0xff] (!%p201_p7)  }
  0x1e   : > { %v853_v22 = vld [vmem:[%s1059_s1 + $0x70] sm:$0xff] (!%p201_p7)   ;;  %704 = vmatprep.mubr.msk.bf16.mxu0 (!%p201_p7), %vm376_vm0, %v859_v19  ;;  %709 = vmatprep.mubr.msk.bf16.mxu1 (!%p201_p7), %vm376_vm0, %v862_v20  ;;  %v855_v24 = vld [vmem:[%s1059_s1 + $0x78] sm:$0x1f] (!%p201_p7)   ;;  %v863_v28 = vld [vmem:[%s999_s29 + $0x24] ss:$8 sps:$4 sm:$0xff] (!%p201_p7)  }
  0x1f   : > { %728 = vmatpush3.bf16.msra.mxu0 (!%p201_p7), %v967_v11  ;;  %750 = vmatpush3.bf16.msra.mxu1 (!%p201_p7), %v967_v11  ;;  %v854_v23 = vld [vmem:[%s1059_s1 + $0x30] sm:$0xff] (!%p201_p7)   ;;  %v856_v25 = vld [vmem:[%s1059_s1 + $0x38] sm:$0xff] (!%p201_p7)   ;;  %v867_v30 = vld [vmem:[%s999_s29 + $0x20] ss:$8 sps:$4 sm:$0xff] (!%p201_p7)  }
  0x20   : > { %729 = vmatprep.subr.bf16.mxu0 (!%p201_p7), %v974_v12  ;;  %751 = vmatprep.subr.bf16.mxu1 (!%p201_p7), %v974_v12  ;;  %v860_v27 = vld [vmem:[%s999_s29 + $0x10] ss:$8 sps:$4 sm:$0xff] (!%p201_p7)   ;;  %v865_v29 = vld [vmem:[%s999_s29 + $0x34] ss:$8 sps:$4 sm:$0xff] (!%p201_p7)   ;;  %v720_v59 = vld [vmem:[%s1060_s2] ss:$0 sm:$0xff] (!%p201_p7) }
  0x21   : > { %v868_v31 = vld [vmem:[%s999_s29 + $0x30] ss:$8 sps:$4 sm:$0xff]   ;;  %s1066_s18 = smov (!%p232_p8, %s684_s18), 3 }
  0x22   : > { %s685_s14 = sshll.u32 %s1066_s18, 3 }
  0x23   : > { %730 = vmatpush3.bf16.msra.mxu0 %v846_v13  ;;  %752 = vmatpush3.bf16.msra.mxu1 %v846_v13  ;;  %s235_s23 = scalar_lea.vmem %s1061_s3, %s685_s14 }
  0x24   : > { %731 = vmatprep.subr.bf16.mxu0 %v847_v14  ;;  %753 = vmatprep.subr.bf16.mxu1 %v847_v14 }
  0x27   : > { %732 = vmatpush3.bf16.msra.mxu0 %v848_v15  ;;  %754 = vmatpush3.bf16.msra.mxu1 %v848_v15 }
  0x28   : > { %733 = vmatprep.subr.bf16.mxu0 %v849_v16  ;;  %755 = vmatprep.subr.bf16.mxu1 %v849_v16 }
  0x2b   : > { %734 = vmatpush3.bf16.msra.mxu0 %v850_v17  ;;  %756 = vmatpush3.bf16.msra.mxu1 %v850_v17 }
  0x2c   : > { %735 = vmatprep.subr.bf16.mxu0 %v851_v18  ;;  %757 = vmatprep.subr.bf16.mxu1 %v851_v18 }
  0x2f   : > { %736 = vmatpush3.bf16.msra.mxu0 %v852_v21  ;;  %758 = vmatpush3.bf16.msra.mxu1 %v852_v21 }
  0x30   : > { %737 = vmatprep.subr.bf16.mxu0 %v853_v22  ;;  %759 = vmatprep.subr.bf16.mxu1 %v853_v22 }
  0x33   : > { %738 = vmatpush3.bf16.msra.mxu0 %v854_v23  ;;  %760 = vmatpush3.bf16.msra.mxu1 %v854_v23 }
  0x34   : > { %813 = vmatprep.subr.msk.bf16.mxu0 %vm380_vm1, %v855_v24  ;;  %814 = vmatprep.subr.msk.bf16.mxu1 %vm380_vm1, %v855_v24 }
  0x37   : > { %740 = vmatpush3.bf16.msra.mxu0 %v856_v25  ;;  %762 = vmatpush3.bf16.msra.mxu1 %v856_v25 }
  0x38   : > { %769 = vmatprep.subr.bf16.mxu0 %v841_v8  ;;  %791 = vmatprep.subr.bf16.mxu1 %v841_v8 }
  0x3a   : > { %417 = vmatmul.mubr.bf16.vlgmr.msra.gmra.mrb[0].mxu0 %v857_v26  ;;  %473 = vmatmul.mubr.bf16.vlgmr.msra.gmra.mrb[0].mxu1 %v860_v27 }
  0x3b   : > { %770 = vmatpush3.bf16.msra.mxu0 %v955_v9  ;;  %792 = vmatpush3.bf16.msra.mxu1 %v955_v9 }
  0x3c   : > { %771 = vmatprep.subr.bf16.mxu0 %v960_v10  ;;  %793 = vmatprep.subr.bf16.mxu1 %v960_v10 }
  0x3d   : > { %714 = vmatprep.mubr.msk.bf16.mxu0 %vm376_vm0, %v863_v28  ;;  %719 = vmatprep.mubr.msk.bf16.mxu1 %vm376_vm0, %v865_v29 }
  0x3f   : > { %772 = vmatpush3.bf16.msra.mxu0 %v967_v11  ;;  %794 = vmatpush3.bf16.msra.mxu1 %v967_v11 }
  0x40   : > { %773 = vmatprep.subr.bf16.mxu0 %v974_v12  ;;  %795 = vmatprep.subr.bf16.mxu1 %v974_v12 }
  0x43   : > { %774 = vmatpush3.bf16.msra.mxu0 %v846_v13  ;;  %796 = vmatpush3.bf16.msra.mxu1 %v846_v13 }
  0x44   : > { %775 = vmatprep.subr.bf16.mxu0 %v847_v14  ;;  %797 = vmatprep.subr.bf16.mxu1 %v847_v14 }
  0x47   : > { %776 = vmatpush3.bf16.msra.mxu0 %v848_v15  ;;  %798 = vmatpush3.bf16.msra.mxu1 %v848_v15 }
  0x48   : > { %777 = vmatprep.subr.bf16.mxu0 %v849_v16  ;;  %799 = vmatprep.subr.bf16.mxu1 %v849_v16 }
  0x4b   : > { %778 = vmatpush3.bf16.msra.mxu0 %v850_v17  ;;  %800 = vmatpush3.bf16.msra.mxu1 %v850_v17 }
  0x4c   : > { %779 = vmatprep.subr.bf16.mxu0 %v851_v18  ;;  %801 = vmatprep.subr.bf16.mxu1 %v851_v18 }
  0x4f   : > { %780 = vmatpush3.bf16.msra.mxu0 %v852_v21  ;;  %802 = vmatpush3.bf16.msra.mxu1 %v852_v21 }
  0x50   : > { %781 = vmatprep.subr.bf16.mxu0 %v853_v22  ;;  %803 = vmatprep.subr.bf16.mxu1 %v853_v22 }
  0x53   : > { %782 = vmatpush3.bf16.msra.mxu0 %v854_v23  ;;  %804 = vmatpush3.bf16.msra.mxu1 %v854_v23 }
  0x54   : > { %815 = vmatprep.subr.msk.bf16.mxu0 %vm380_vm1, %v855_v24  ;;  %816 = vmatprep.subr.msk.bf16.mxu1 %vm380_vm1, %v855_v24 }
  0x57   : > { %784 = vmatpush3.bf16.msra.mxu0 %v856_v25  ;;  %806 = vmatpush3.bf16.msra.mxu1 %v856_v25 }
  0x5a   : > { %531 = vmatmul.mubr.bf16.vlgmr.msra.gmra.mrb[4].mxu0 %v867_v30  ;;  %589 = vmatmul.mubr.bf16.vlgmr.msra.gmra.mrb[4].mxu1 %v868_v31 }
 0x10d   : > { %v741_v32 = vpop.f32.mrb[0].mxu0  ;;  %v763_v33 = vpop.f32.mrb[0].mxu1 }
 0x10e   : > { %v742_v34 = vpop.f32.mrb[1].mxu0  ;;  %v764_v35 = vpop.f32.mrb[1].mxu1 }
 0x10f   : > { %v743_v36 = vadd.f32 %v742_v34, %v741_v32  ;;  %v765_v37 = vadd.f32 %v764_v35, %v763_v33  ;;  %v744_v38 = vpop.f32.mrb[2].mxu0  ;;  %v766_v39 = vpop.f32.mrb[2].mxu1 }
 0x110   : > { %v745_v40 = vpop.f32.mrb[3].mxu0  ;;  %v767_v41 = vpop.f32.mrb[3].mxu1 }
 0x111   : > { %v481_v42 = vmax.f32 %v743_v36, %v765_v37  ;;  %v746_v43 = vadd.f32 %v745_v40, %v744_v38  ;;  %v768_v44 = vadd.f32 %v767_v41, %v766_v39 }
 0x113   : > { %v482_v45 = vmax.f32 %v746_v43, %v768_v44 }
 0x12d   : > { %v785_v46 = vpop.f32.mrb[4].mxu0  ;;  %v807_v47 = vpop.f32.mrb[4].mxu1 }
 0x12e   : > { %v786_v48 = vpop.f32.mrb[5].mxu0  ;;  %v808_v49 = vpop.f32.mrb[5].mxu1 }
 0x12f   : > { %v787_v50 = vadd.f32 %v786_v48, %v785_v46  ;;  %v809_v51 = vadd.f32 %v808_v49, %v807_v47  ;;  %v788_v52 = vpop.f32.mrb[6].mxu0  ;;  %v810_v53 = vpop.f32.mrb[6].mxu1 }
 0x130   : > { %v789_v54 = vpop.f32.mrb[7].mxu0  ;;  %v811_v55 = vpop.f32.mrb[7].mxu1 }
 0x131   : > { %v539_v56 = vmax.f32 %v481_v42, %v787_v50  ;;  %v790_v57 = vadd.f32 %v789_v54, %v788_v52  ;;  %v812_v58 = vadd.f32 %v811_v55, %v810_v53 }
 0x133   : > { %v597_v60 = vmax.f32 %v539_v56, %v809_v51  ;;  %v540_v61 = vmax.f32 %v482_v45, %v790_v57 }
 0x135   : > { %v606_v62 = vadd.f32 %v720_v59, %v597_v60  ;;  %v598_v63 = vmax.f32 %v540_v61, %v812_v58 }
 0x137   : > { %v608_v0 = vmax.f32 %v606_v62, 0.0  ;;  %v607_v1 = vadd.f32 %v720_v59, %v598_v63 }
 0x139   : > { %610 = vst [vmem:[%s235_s23] sm:$0xff] %v608_v0  ;;  %v609_v2 = vmax.f32 %v607_v1, 0.0 }
 0x13b   : > { %611 = vst [vmem:[%s235_s23 + $0x8] sm:$0xff] %v609_v2 }
 0x13c PF: > { %p10_p9 = scmp.ge.s32.totalorder %s930_s16, 4   ;;  %s1062_s12 = smov %s887_s13 }
 0x13d   : > { %s1063_s13 = smov %s939_s19  ;;  %s1064_s14 = smov %s930_s16 }
 0x13e   :  { %12 = sbr.rel (!%p10_p9) target bundleno = 2 (0x2), region = 108 }

</bundles_post_ra>
